<compile_context>
chip_gen: v5e
topology: v5e:2x2
jax: 0.10.0
libtpu: 0.0.40
codegen_flags: <defaults>
</compile_context>

<pallas_src>
import jax
import jax.numpy as jnp
from jax.experimental import pallas as pl
from jax.experimental.pallas import tpu as pltpu


def _round_up(n, m):
    return ((n + m - 1) // m) * m


def _mod(a, m):
    # power-of-two fast path (VPU AND); generic fallback otherwise
    return a & (m - 1) if (m & (m - 1)) == 0 else a % m


def _div(a, m):
    if (m & (m - 1)) == 0:
        return a >> (m.bit_length() - 1)
    return a // m


# ------------------------------ fused kernel ------------------------------- #

def _make_fused_kernel(H, W, B, c_in, c_mid, c_out):
    """conv3x3(SAME)+ReLU -> conv3x3(SAME)+ReLU -> per-image GAP.

    B images lane-concatenated: channels on sublanes, flattened B*H*W on
    lanes.  Each conv is ONE im2col contraction on the MXU; the 9 taps are
    static pltpu.roll lane rotations with per-image edge masks.
    """
    HW = H * W
    L = B * HW
    cin_p = _round_up(c_in, 8)     # sublane-aligned tap packing (conv1)
    cmid_p = _round_up(c_mid, 8)

    def kernel(x_ref, w1_ref, b1_ref, w2_ref, b2_ref, o_ref):
        # x_ref : (c_in, L)           w1_ref: (c_mid, 9*cin_p)   b1_ref: (c_mid, 1)
        # w2_ref: (c_out, 9*cmid_p)   b2_ref: (c_out, 1)         o_ref : (c_out, B)
        lane = jax.lax.broadcasted_iota(jnp.int32, (1, L), 1)
        q = _mod(lane, HW)            # flat position within its own image
        col = _mod(q, W)
        row = _div(q, W)
        mask_l = col > 0              # tap reads column w-1: invalid at w == 0
        mask_r = col < (W - 1)        # tap reads column w+1: invalid at w == W-1
        mask_t = row > 0              # tap reads row h-1 (roll wraps -> mask)
        mask_b = row < (H - 1)        # tap reads row h+1

        def conv3x3_relu(x, cin, cinp, w_mat, b):
            # x: (cin, L) -> (Cout, L); single K = 9*cinp MXU contraction.
            if cinp != cin:           # pad channels to a sublane multiple
                x = jnp.concatenate(
                    [x, jnp.zeros((cinp - cin, L), jnp.float32)], axis=0)
            taps = []
            for dh in range(3):
                for dw in range(3):
                    # tap value at lane p is x[p + (dh-1)*W + (dw-1)]
                    shift = ((1 - dh) * W + (1 - dw)) % L
                    t = pltpu.roll(x, shift, axis=1) if shift else x
                    m = None
                    if dh == 0:
                        m = mask_t
                    elif dh == 2:
                        m = mask_b
                    if dw == 0:
                        m = mask_l if m is None else jnp.logical_and(m, mask_l)
                    elif dw == 2:
                        m = mask_r if m is None else jnp.logical_and(m, mask_r)
                    if m is not None:
                        t = jnp.where(m, t, 0.0)      # SAME zero-padding
                    taps.append(t)                    # (cinp, L), aligned
            patches = jnp.concatenate(taps, axis=0)   # (9*cinp, L)
            y = jnp.dot(w_mat, patches,
                        preferred_element_type=jnp.float32)  # (Cout, L)
            return jnp.maximum(y + b, 0.0)

        y1 = conv3x3_relu(x_ref[...], c_in, cin_p, w1_ref[...], b1_ref[...])
        y2 = conv3x3_relu(y1, c_mid, cmid_p, w2_ref[...], b2_ref[...])

        # Global average pool per image: lane-aligned static slices (HW is a
        # multiple of 128) + one cross-lane reduction each.
        inv = 1.0 / HW
        cols = [jnp.sum(y2[:, b * HW:(b + 1) * HW], axis=1, keepdims=True) * inv
                for b in range(B)]
        gap = cols[0] if B == 1 else jnp.concatenate(cols, axis=1)  # (c_out, B)
        o_ref[...] = gap.astype(o_ref.dtype)

    return kernel


# -------------------------------- wrappers ---------------------------------- #

def prepare_params(params):
    """One-time weight prep, hoisted out of the per-call (jitted) path."""
    w1, b1, w2, b2 = params["w1"], params["b1"], params["w2"], params["b2"]
    c_in, c_mid = w1.shape[2], w1.shape[3]
    c_out = w2.shape[3]
    cin_p, cmid_p = _round_up(c_in, 8), _round_up(c_mid, 8)
    # Pad the input-channel axis with zeros so in-kernel tap packing stays
    # sublane-aligned; extra K columns multiply zero activations -> exact.
    w1p = jnp.pad(w1, ((0, 0), (0, 0), (0, cin_p - c_in), (0, 0)))
    w2p = jnp.pad(w2, ((0, 0), (0, 0), (0, cmid_p - c_mid), (0, 0)))
    return dict(
        w1m=jnp.asarray(w1p.reshape(9 * cin_p, c_mid).T),    # (c_mid, 9*cin_p)
        w2m=jnp.asarray(w2p.reshape(9 * cmid_p, c_out).T),   # (c_out, 9*cmid_p)
        b1c=b1.reshape(c_mid, 1),
        b2c=b2.reshape(c_out, 1),
    )


@jax.jit
def feature_extractor_forward(x_nchw, w1m, b1c, w2m, b2c):
    """x_nchw: (N, C, H, W) float32 -> features (N, c_out). One fused pallas_call."""
    N, c_in, H, W = x_nchw.shape
    c_mid, c_out = w1m.shape[0], w2m.shape[0]
    HW, L = H * W, N * H * W

    # Layout plumbing only: lane-concatenate the images (channels on sublanes).
    x_slab = (x_nchw.reshape(N, c_in, HW)
              .transpose(1, 0, 2)
              .reshape(c_in, L))

    out = pl.pallas_call(
        _make_fused_kernel(H, W, N, c_in, c_mid, c_out),
        out_shape=jax.ShapeDtypeStruct((c_out, N), jnp.float32),
        grid=(1,),                      # single step: whole batch lane-batched
        in_specs=[
            pl.BlockSpec((c_in, L), lambda n: (0, 0)),
            pl.BlockSpec(w1m.shape, lambda n: (0, 0)),
            pl.BlockSpec(b1c.shape, lambda n: (0, 0)),
            pl.BlockSpec(w2m.shape, lambda n: (0, 0)),
            pl.BlockSpec(b2c.shape, lambda n: (0, 0)),
        ],
        out_specs=pl.BlockSpec((c_out, N), lambda n: (0, 0)),
        compiler_params=pltpu.CompilerParams(
            dimension_semantics=("arbitrary",)),
    )(x_slab, w1m, b1c, w2m, b2c)
    return out.T                        # (N, c_out); Flatten of the (1,1) GAP


def init_params(key, c_in=4, c_mid=8, c_out=16):
    k1, k2, k3, k4 = jax.random.split(key, 4)
    w1 = jax.random.normal(k1, (3, 3, c_in, c_mid), jnp.float32) * 0.1   # HWIO
    b1 = jax.random.normal(k2, (c_mid,), jnp.float32) * 0.1
    w2 = jax.random.normal(k3, (3, 3, c_mid, c_out), jnp.float32) * 0.1  # HWIO
    b2 = jax.random.normal(k4, (c_out,), jnp.float32) * 0.1
    return dict(w1=w1, b1=b1, w2=w2, b2=b2)


# ------------------------- pure-JAX reference ------------------------------- #

def _ref_forward(x_nchw, params):
    def conv(x, w_hwio, b):
        y = jax.lax.conv_general_dilated(
            x, jnp.transpose(w_hwio, (3, 2, 0, 1)), (1, 1), "SAME",
            dimension_numbers=("NCHW", "OIHW", "NCHW"))
        return jax.nn.relu(y + b[None, :, None, None])
    y = conv(x_nchw, params["w1"], params["b1"])
    y = conv(y, params["w2"], params["b2"])
    return jnp.mean(y, axis=(2, 3))


# ---------------------------------- main ------------------------------------ #

if __name__ == "__main__":
    key = jax.random.PRNGKey(0)
    kx, kp = jax.random.split(key)
    x = jax.random.normal(kx, (2, 4, 16, 16), jnp.float32)     # NCHW input
    params = init_params(kp)
    prepped = prepare_params(params)                           # hoisted prep

    out = jax.block_until_ready(
        feature_extractor_forward(x, prepped["w1m"], prepped["b1c"],
                                  prepped["w2m"], prepped["b2c"]))
    ref = jax.block_until_ready(_ref_forward(x, params))

    assert out.shape == (2, 16) and out.dtype == jnp.float32
    assert jnp.allclose(out, ref, atol=1e-4, rtol=1e-4), "mismatch vs reference"

    print("KERNEL_OK")
</pallas_src>

<mosaic_0001>
module attributes {stable_mosaic.version = 11 : i64} {
  func.func @kernel(%arg0: i32, %arg1: memref<4x512xf32, #tpu.memory_space<vmem>>, %arg2: memref<8x72xf32, #tpu.memory_space<vmem>>, %arg3: memref<8x1xf32, #tpu.memory_space<vmem>>, %arg4: memref<16x72xf32, #tpu.memory_space<vmem>>, %arg5: memref<16x1xf32, #tpu.memory_space<vmem>>, %arg6: memref<16x2xf32, #tpu.memory_space<vmem>>) attributes {dimension_semantics = [#tpu.dimension_semantics<arbitrary>], iteration_bounds = array<i64: 1>, scalar_prefetch = 0 : i64, scratch_operands = 0 : i64, tpu.core_type = #tpu.core_type<tc>, window_params = [{pipeline_mode = #tpu.pipeline_mode<synchronous>, transform_indices = @transform_0, window_bounds = array<i64: 4, 512>}, {pipeline_mode = #tpu.pipeline_mode<synchronous>, transform_indices = @transform_1, window_bounds = array<i64: 8, 72>}, {pipeline_mode = #tpu.pipeline_mode<synchronous>, transform_indices = @transform_2, window_bounds = array<i64: 8, 1>}, {pipeline_mode = #tpu.pipeline_mode<synchronous>, transform_indices = @transform_3, window_bounds = array<i64: 16, 72>}, {pipeline_mode = #tpu.pipeline_mode<synchronous>, transform_indices = @transform_4, window_bounds = array<i64: 16, 1>}, {pipeline_mode = #tpu.pipeline_mode<synchronous>, transform_indices = @transform_5, window_bounds = array<i64: 16, 2>}]} {
    %0 = tpu.iota {dimensions = array<i32: 1>} : vector<1x512xi32>
    %c255_i32 = arith.constant 255 : i32
    %1 = vector.broadcast %c255_i32 : i32 to vector<1x512xi32>
    %2 = arith.andi %0, %1 : vector<1x512xi32>
    %c15_i32 = arith.constant 15 : i32
    %3 = vector.broadcast %c15_i32 : i32 to vector<1x512xi32>
    %4 = arith.andi %2, %3 : vector<1x512xi32>
    %c4_i32 = arith.constant 4 : i32
    %5 = vector.broadcast %c4_i32 : i32 to vector<1x512xi32>
    %6 = arith.shrsi %2, %5 : vector<1x512xi32>
    %c0_i32 = arith.constant 0 : i32
    %7 = vector.broadcast %c0_i32 : i32 to vector<1x512xi32>
    %8 = arith.cmpi sgt, %4, %7 : vector<1x512xi32>
    %c15_i32_0 = arith.constant 15 : i32
    %9 = vector.broadcast %c15_i32_0 : i32 to vector<1x512xi32>
    %10 = arith.cmpi slt, %4, %9 : vector<1x512xi32>
    %c0_i32_1 = arith.constant 0 : i32
    %11 = vector.broadcast %c0_i32_1 : i32 to vector<1x512xi32>
    %12 = arith.cmpi sgt, %6, %11 : vector<1x512xi32>
    %c15_i32_2 = arith.constant 15 : i32
    %13 = vector.broadcast %c15_i32_2 : i32 to vector<1x512xi32>
    %14 = arith.cmpi slt, %6, %13 : vector<1x512xi32>
    %c0 = arith.constant 0 : index
    %c0_3 = arith.constant 0 : index
    %15 = vector.load %arg1[%c0, %c0_3] : memref<4x512xf32, #tpu.memory_space<vmem>>, vector<4x512xf32>
    %c0_4 = arith.constant 0 : index
    %c0_5 = arith.constant 0 : index
    %16 = vector.load %arg2[%c0_4, %c0_5] : memref<8x72xf32, #tpu.memory_space<vmem>>, vector<8x72xf32>
    %c0_6 = arith.constant 0 : index
    %c0_7 = arith.constant 0 : index
    %17 = vector.load %arg3[%c0_6, %c0_7] : memref<8x1xf32, #tpu.memory_space<vmem>>, vector<8x1xf32>
    %cst = arith.constant 0.000000e+00 : f32
    %18 = vector.broadcast %cst : f32 to vector<4x512xf32>
    %19 = tpu.concatenate %15, %18 in 0 : vector<4x512xf32>, vector<4x512xf32> -> vector<8x512xf32>
    %c17_i32 = arith.constant 17 : i32
    %20 = tpu.dynamic_rotate %19 by %c17_i32 dim 1 : vector<8x512xf32>, i32 -> vector<8x512xf32>
    %21 = arith.andi %12, %8 : vector<1x512xi1>
    %cst_8 = arith.constant 0.000000e+00 : f32
    %22 = vector.shape_cast %21 : vector<1x512xi1> to vector<1x512xi1>
    %23 = vector.broadcast %22 : vector<1x512xi1> to vector<8x512xi1>
    %24 = vector.broadcast %cst_8 : f32 to vector<8x512xf32>
    %25 = arith.select %23, %20, %24 : vector<8x512xi1>, vector<8x512xf32>
    %c16_i32 = arith.constant 16 : i32
    %26 = tpu.dynamic_rotate %19 by %c16_i32 dim 1 : vector<8x512xf32>, i32 -> vector<8x512xf32>
    %cst_9 = arith.constant 0.000000e+00 : f32
    %27 = vector.shape_cast %12 : vector<1x512xi1> to vector<1x512xi1>
    %28 = vector.broadcast %27 : vector<1x512xi1> to vector<8x512xi1>
    %29 = vector.broadcast %cst_9 : f32 to vector<8x512xf32>
    %30 = arith.select %28, %26, %29 : vector<8x512xi1>, vector<8x512xf32>
    %c15_i32_10 = arith.constant 15 : i32
    %31 = tpu.dynamic_rotate %19 by %c15_i32_10 dim 1 : vector<8x512xf32>, i32 -> vector<8x512xf32>
    %32 = arith.andi %12, %10 : vector<1x512xi1>
    %cst_11 = arith.constant 0.000000e+00 : f32
    %33 = vector.shape_cast %32 : vector<1x512xi1> to vector<1x512xi1>
    %34 = vector.broadcast %33 : vector<1x512xi1> to vector<8x512xi1>
    %35 = vector.broadcast %cst_11 : f32 to vector<8x512xf32>
    %36 = arith.select %34, %31, %35 : vector<8x512xi1>, vector<8x512xf32>
    %c1_i32 = arith.constant 1 : i32
    %37 = tpu.dynamic_rotate %19 by %c1_i32 dim 1 : vector<8x512xf32>, i32 -> vector<8x512xf32>
    %cst_12 = arith.constant 0.000000e+00 : f32
    %38 = vector.shape_cast %8 : vector<1x512xi1> to vector<1x512xi1>
    %39 = vector.broadcast %38 : vector<1x512xi1> to vector<8x512xi1>
    %40 = vector.broadcast %cst_12 : f32 to vector<8x512xf32>
    %41 = arith.select %39, %37, %40 : vector<8x512xi1>, vector<8x512xf32>
    %c511_i32 = arith.constant 511 : i32
    %42 = tpu.dynamic_rotate %19 by %c511_i32 dim 1 : vector<8x512xf32>, i32 -> vector<8x512xf32>
    %cst_13 = arith.constant 0.000000e+00 : f32
    %43 = vector.shape_cast %10 : vector<1x512xi1> to vector<1x512xi1>
    %44 = vector.broadcast %43 : vector<1x512xi1> to vector<8x512xi1>
    %45 = vector.broadcast %cst_13 : f32 to vector<8x512xf32>
    %46 = arith.select %44, %42, %45 : vector<8x512xi1>, vector<8x512xf32>
    %c497_i32 = arith.constant 497 : i32
    %47 = tpu.dynamic_rotate %19 by %c497_i32 dim 1 : vector<8x512xf32>, i32 -> vector<8x512xf32>
    %48 = arith.andi %14, %8 : vector<1x512xi1>
    %cst_14 = arith.constant 0.000000e+00 : f32
    %49 = vector.shape_cast %48 : vector<1x512xi1> to vector<1x512xi1>
    %50 = vector.broadcast %49 : vector<1x512xi1> to vector<8x512xi1>
    %51 = vector.broadcast %cst_14 : f32 to vector<8x512xf32>
    %52 = arith.select %50, %47, %51 : vector<8x512xi1>, vector<8x512xf32>
    %c496_i32 = arith.constant 496 : i32
    %53 = tpu.dynamic_rotate %19 by %c496_i32 dim 1 : vector<8x512xf32>, i32 -> vector<8x512xf32>
    %cst_15 = arith.constant 0.000000e+00 : f32
    %54 = vector.shape_cast %14 : vector<1x512xi1> to vector<1x512xi1>
    %55 = vector.broadcast %54 : vector<1x512xi1> to vector<8x512xi1>
    %56 = vector.broadcast %cst_15 : f32 to vector<8x512xf32>
    %57 = arith.select %55, %53, %56 : vector<8x512xi1>, vector<8x512xf32>
    %c495_i32 = arith.constant 495 : i32
    %58 = tpu.dynamic_rotate %19 by %c495_i32 dim 1 : vector<8x512xf32>, i32 -> vector<8x512xf32>
    %59 = arith.andi %14, %10 : vector<1x512xi1>
    %cst_16 = arith.constant 0.000000e+00 : f32
    %60 = vector.shape_cast %59 : vector<1x512xi1> to vector<1x512xi1>
    %61 = vector.broadcast %60 : vector<1x512xi1> to vector<8x512xi1>
    %62 = vector.broadcast %cst_16 : f32 to vector<8x512xf32>
    %63 = arith.select %61, %58, %62 : vector<8x512xi1>, vector<8x512xf32>
    %64 = tpu.concatenate %25, %30, %36, %41, %19, %46, %52, %57, %63 in 0 : vector<8x512xf32>, vector<8x512xf32>, vector<8x512xf32>, vector<8x512xf32>, vector<8x512xf32>, vector<8x512xf32>, vector<8x512xf32>, vector<8x512xf32>, vector<8x512xf32> -> vector<72x512xf32>
    %cst_17 = arith.constant dense<0.000000e+00> : vector<8x512xf32>
    %65 = tpu.matmul %16, %64, %cst_17 {dimension_numbers = #tpu.dot_dimension_numbers<[1], [0], [0], [1], [0, 0, 1, 1], [], []>} : vector<8x72xf32>, vector<72x512xf32>, vector<8x512xf32> -> vector<8x512xf32>
    %66 = vector.broadcast %17 : vector<8x1xf32> to vector<8x512xf32>
    %67 = arith.addf %65, %66 : vector<8x512xf32>
    %cst_18 = arith.constant 0.000000e+00 : f32
    %68 = vector.broadcast %cst_18 : f32 to vector<8x512xf32>
    %69 = arith.maximumf %67, %68 : vector<8x512xf32>
    %c0_19 = arith.constant 0 : index
    %c0_20 = arith.constant 0 : index
    %70 = vector.load %arg4[%c0_19, %c0_20] : memref<16x72xf32, #tpu.memory_space<vmem>>, vector<16x72xf32>
    %c0_21 = arith.constant 0 : index
    %c0_22 = arith.constant 0 : index
    %71 = vector.load %arg5[%c0_21, %c0_22] : memref<16x1xf32, #tpu.memory_space<vmem>>, vector<16x1xf32>
    %c17_i32_23 = arith.constant 17 : i32
    %72 = tpu.dynamic_rotate %69 by %c17_i32_23 dim 1 : vector<8x512xf32>, i32 -> vector<8x512xf32>
    %73 = arith.andi %12, %8 : vector<1x512xi1>
    %cst_24 = arith.constant 0.000000e+00 : f32
    %74 = vector.shape_cast %73 : vector<1x512xi1> to vector<1x512xi1>
    %75 = vector.broadcast %74 : vector<1x512xi1> to vector<8x512xi1>
    %76 = vector.broadcast %cst_24 : f32 to vector<8x512xf32>
    %77 = arith.select %75, %72, %76 : vector<8x512xi1>, vector<8x512xf32>
    %c16_i32_25 = arith.constant 16 : i32
    %78 = tpu.dynamic_rotate %69 by %c16_i32_25 dim 1 : vector<8x512xf32>, i32 -> vector<8x512xf32>
    %cst_26 = arith.constant 0.000000e+00 : f32
    %79 = vector.shape_cast %12 : vector<1x512xi1> to vector<1x512xi1>
    %80 = vector.broadcast %79 : vector<1x512xi1> to vector<8x512xi1>
    %81 = vector.broadcast %cst_26 : f32 to vector<8x512xf32>
    %82 = arith.select %80, %78, %81 : vector<8x512xi1>, vector<8x512xf32>
    %c15_i32_27 = arith.constant 15 : i32
    %83 = tpu.dynamic_rotate %69 by %c15_i32_27 dim 1 : vector<8x512xf32>, i32 -> vector<8x512xf32>
    %84 = arith.andi %12, %10 : vector<1x512xi1>
    %cst_28 = arith.constant 0.000000e+00 : f32
    %85 = vector.shape_cast %84 : vector<1x512xi1> to vector<1x512xi1>
    %86 = vector.broadcast %85 : vector<1x512xi1> to vector<8x512xi1>
    %87 = vector.broadcast %cst_28 : f32 to vector<8x512xf32>
    %88 = arith.select %86, %83, %87 : vector<8x512xi1>, vector<8x512xf32>
    %c1_i32_29 = arith.constant 1 : i32
    %89 = tpu.dynamic_rotate %69 by %c1_i32_29 dim 1 : vector<8x512xf32>, i32 -> vector<8x512xf32>
    %cst_30 = arith.constant 0.000000e+00 : f32
    %90 = vector.shape_cast %8 : vector<1x512xi1> to vector<1x512xi1>
    %91 = vector.broadcast %90 : vector<1x512xi1> to vector<8x512xi1>
    %92 = vector.broadcast %cst_30 : f32 to vector<8x512xf32>
    %93 = arith.select %91, %89, %92 : vector<8x512xi1>, vector<8x512xf32>
    %c511_i32_31 = arith.constant 511 : i32
    %94 = tpu.dynamic_rotate %69 by %c511_i32_31 dim 1 : vector<8x512xf32>, i32 -> vector<8x512xf32>
    %cst_32 = arith.constant 0.000000e+00 : f32
    %95 = vector.shape_cast %10 : vector<1x512xi1> to vector<1x512xi1>
    %96 = vector.broadcast %95 : vector<1x512xi1> to vector<8x512xi1>
    %97 = vector.broadcast %cst_32 : f32 to vector<8x512xf32>
    %98 = arith.select %96, %94, %97 : vector<8x512xi1>, vector<8x512xf32>
    %c497_i32_33 = arith.constant 497 : i32
    %99 = tpu.dynamic_rotate %69 by %c497_i32_33 dim 1 : vector<8x512xf32>, i32 -> vector<8x512xf32>
    %100 = arith.andi %14, %8 : vector<1x512xi1>
    %cst_34 = arith.constant 0.000000e+00 : f32
    %101 = vector.shape_cast %100 : vector<1x512xi1> to vector<1x512xi1>
    %102 = vector.broadcast %101 : vector<1x512xi1> to vector<8x512xi1>
    %103 = vector.broadcast %cst_34 : f32 to vector<8x512xf32>
    %104 = arith.select %102, %99, %103 : vector<8x512xi1>, vector<8x512xf32>
    %c496_i32_35 = arith.constant 496 : i32
    %105 = tpu.dynamic_rotate %69 by %c496_i32_35 dim 1 : vector<8x512xf32>, i32 -> vector<8x512xf32>
    %cst_36 = arith.constant 0.000000e+00 : f32
    %106 = vector.shape_cast %14 : vector<1x512xi1> to vector<1x512xi1>
    %107 = vector.broadcast %106 : vector<1x512xi1> to vector<8x512xi1>
    %108 = vector.broadcast %cst_36 : f32 to vector<8x512xf32>
    %109 = arith.select %107, %105, %108 : vector<8x512xi1>, vector<8x512xf32>
    %c495_i32_37 = arith.constant 495 : i32
    %110 = tpu.dynamic_rotate %69 by %c495_i32_37 dim 1 : vector<8x512xf32>, i32 -> vector<8x512xf32>
    %111 = arith.andi %14, %10 : vector<1x512xi1>
    %cst_38 = arith.constant 0.000000e+00 : f32
    %112 = vector.shape_cast %111 : vector<1x512xi1> to vector<1x512xi1>
    %113 = vector.broadcast %112 : vector<1x512xi1> to vector<8x512xi1>
    %114 = vector.broadcast %cst_38 : f32 to vector<8x512xf32>
    %115 = arith.select %113, %110, %114 : vector<8x512xi1>, vector<8x512xf32>
    %116 = tpu.concatenate %77, %82, %88, %93, %69, %98, %104, %109, %115 in 0 : vector<8x512xf32>, vector<8x512xf32>, vector<8x512xf32>, vector<8x512xf32>, vector<8x512xf32>, vector<8x512xf32>, vector<8x512xf32>, vector<8x512xf32>, vector<8x512xf32> -> vector<72x512xf32>
    %cst_39 = arith.constant dense<0.000000e+00> : vector<16x512xf32>
    %117 = tpu.matmul %70, %116, %cst_39 {dimension_numbers = #tpu.dot_dimension_numbers<[1], [0], [0], [1], [0, 0, 1, 1], [], []>} : vector<16x72xf32>, vector<72x512xf32>, vector<16x512xf32> -> vector<16x512xf32>
    %118 = vector.broadcast %71 : vector<16x1xf32> to vector<16x512xf32>
    %119 = arith.addf %117, %118 : vector<16x512xf32>
    %cst_40 = arith.constant 0.000000e+00 : f32
    %120 = vector.broadcast %cst_40 : f32 to vector<16x512xf32>
    %121 = arith.maximumf %119, %120 : vector<16x512xf32>
    %122 = vector.extract_strided_slice %121 {offsets = [0, 0], sizes = [16, 256], strides = [1, 1]} : vector<16x512xf32> to vector<16x256xf32>
    %cst_41 = arith.constant dense<0.000000e+00> : vector<16xf32>
    %123 = vector.multi_reduction <add>, %122, %cst_41 [1] : vector<16x256xf32> to vector<16xf32>
    %124 = vector.shape_cast %123 : vector<16xf32> to vector<16x1xf32>
    %cst_42 = arith.constant 3.906250e-03 : f32
    %125 = vector.broadcast %cst_42 : f32 to vector<16x1xf32>
    %126 = arith.mulf %124, %125 : vector<16x1xf32>
    %127 = vector.extract_strided_slice %121 {offsets = [0, 256], sizes = [16, 256], strides = [1, 1]} : vector<16x512xf32> to vector<16x256xf32>
    %cst_43 = arith.constant dense<0.000000e+00> : vector<16xf32>
    %128 = vector.multi_reduction <add>, %127, %cst_43 [1] : vector<16x256xf32> to vector<16xf32>
    %129 = vector.shape_cast %128 : vector<16xf32> to vector<16x1xf32>
    %cst_44 = arith.constant 3.906250e-03 : f32
    %130 = vector.broadcast %cst_44 : f32 to vector<16x1xf32>
    %131 = arith.mulf %129, %130 : vector<16x1xf32>
    %132 = tpu.concatenate %126, %131 in 1 : vector<16x1xf32>, vector<16x1xf32> -> vector<16x2xf32>
    %c0_45 = arith.constant 0 : index
    %c0_46 = arith.constant 0 : index
    %133 = vector.load %arg6[%c0_45, %c0_46] : memref<16x2xf32, #tpu.memory_space<vmem>>, vector<16x2xf32>
    tpu.vector_store %arg6[%c0_45, %c0_46], %132 {strides = array<i32>} : memref<16x2xf32, #tpu.memory_space<vmem>>, vector<16x2xf32>,
    return
  }
  func.func @transform_0(%arg0: i32) -> (i32, i32) {
    %c0_i32 = arith.constant 0 : i32
    %c0_i32_0 = arith.constant 0 : i32
    %c0_i32_1 = arith.constant 0 : i32
    return %c0_i32, %c0_i32_0 : i32, i32
  }
  func.func @transform_1(%arg0: i32) -> (i32, i32) {
    %c0_i32 = arith.constant 0 : i32
    %c0_i32_0 = arith.constant 0 : i32
    %c0_i32_1 = arith.constant 0 : i32
    return %c0_i32, %c0_i32_0 : i32, i32
  }
  func.func @transform_2(%arg0: i32) -> (i32, i32) {
    %c0_i32 = arith.constant 0 : i32
    %c0_i32_0 = arith.constant 0 : i32
    %c0_i32_1 = arith.constant 0 : i32
    return %c0_i32, %c0_i32_0 : i32, i32
  }
  func.func @transform_3(%arg0: i32) -> (i32, i32) {
    %c0_i32 = arith.constant 0 : i32
    %c0_i32_0 = arith.constant 0 : i32
    %c0_i32_1 = arith.constant 0 : i32
    return %c0_i32, %c0_i32_0 : i32, i32
  }
  func.func @transform_4(%arg0: i32) -> (i32, i32) {
    %c0_i32 = arith.constant 0 : i32
    %c0_i32_0 = arith.constant 0 : i32
    %c0_i32_1 = arith.constant 0 : i32
    return %c0_i32, %c0_i32_0 : i32, i32
  }
  func.func @transform_5(%arg0: i32) -> (i32, i32) {
    %c0_i32 = arith.constant 0 : i32
    %c0_i32_0 = arith.constant 0 : i32
    %c0_i32_1 = arith.constant 0 : i32
    return %c0_i32, %c0_i32_0 : i32, i32
  }
}

</mosaic_0001>

<bundles_post_ra>
// kernel: feature_extractor_forward.1
= control target key start
LH: loop header
LB: loop body
LE: loop exit
PB: predicated region body
PF: predicated region fallthrough
CT: control target
= control target key end

     0   :  { %vm1420_vm0 = vcmask 1043456   ;;  %s749_s22 = smov 111   ;;  %s750_s23 = smov 112   ;;  %v20_v10 = vlaneseq  ;;  %v1452_v34 = vmov 0  ;;  %s1409_s0 = inlined_call_operand.vmem [shape: f32[4,512], index: 0, kind: input, shape index: {}]   ;;  %s1410_s2 = inlined_call_operand.vmem [shape: f32[8,1], index: 2, kind: input, shape index: {}]   ;;  %s1411_s1 = inlined_call_operand.vmem [shape: f32[8,72], index: 1, kind: input, shape index: {}]   ;;  %s1412_s4 = inlined_call_operand.vmem [shape: f32[16,1], index: 4, kind: input, shape index: {}]   ;;  %s1413_s3 = inlined_call_operand.vmem [shape: f32[16,72], index: 3, kind: input, shape index: {}]   ;;  %s1414_s5 = inlined_call_operand.vmem [shape: f32[16,2], index: 5, kind: output, shape index: {}]  }
   0x1   :  { %v54_v0 = vld [vmem:[%s1409_s0 + $0x8] sm:$0xff]  ;;  %v53_v1 = vld [vmem:[%s1409_s0] sm:$0xff]  ;;  %s751_s0 = smov 113   ;;  %s752_s24 = smov 127  }
   0x2   :  { %61 = vst [vmem:[#allocation1 + $0x10] ss:$2 sm:$0xff] %v54_v0  ;;  %s753_s25 = smov 1   ;;  %s754_s26 = smov 15   ;;  %v842_v11 = vand.u32 127, %v20_v10  ;;  %v1469_v10 = vmov 0 }
   0x3   :  { %59 = vst [vmem:[#allocation1] ss:$2 sm:$0xff] %v53_v1  ;;  %s755_s27 = smov 16   ;;  %s756_s28 = smov 17  }
   0x4   :  { %v24_v13 = vadd.s32 384, %v842_v11  ;;  %v23_v18 = vadd.s32 256, %v842_v11  ;;  %vm1423_vm3 = vcmp.lt.s32.totalorder %v842_v11, 111  ;;  %vm1424_vm8 = vcmp.lt.s32.totalorder %v842_v11, 112 }
   0x5   :  { %vm1427_vm11 = vcmp.lt.s32.totalorder %v842_v11, 113  ;;  %v22_v39 = vadd.s32 128, %v842_v11  ;;  %v25_v41 = vand.u32 255, %v842_v11  ;;  %vm1418_vm14 = vcmp.lt.s32.totalorder %v842_v11, 127 }
   0x6   :  { %v28_v14 = vand.u32 255, %v24_v13  ;;  %v27_v19 = vand.u32 255, %v23_v18  ;;  %v56_v18 = vld [vmem:[%s1410_s2] sm:$0xff] }
   0x7   :  { %v26_v42 = vand.u32 255, %v22_v39  ;;  %v929_v45 = vand.u32 15, %v25_v41  ;;  %v931_v46 = vshra.s32 %v25_v41, 4  ;;  %v1487_v39 = vmov 0 }
   0x8   :  { %v847_v16 = vand.u32 15, %v28_v14  ;;  %v849_v17 = vshra.s32 %v28_v14, 4  ;;  %v863_v23 = vand.u32 15, %v27_v19  ;;  %v865_v24 = vshra.s32 %v27_v19, 4 }
   0x9   :  { %v794_v2 = vld.sshfl [vmem:[#allocation1 + $0x18] sm:$0xff pattern:$0x75316420]  ;;  %v796_v3 = vld.sshfl [vmem:[#allocation1 + $0x10] sm:$0xff pattern:$0x75316420] }
   0xa   :  { %v74_v4 = vsel %vm1420_vm0, %v794_v2, 0.0  ;;  %v73_v5 = vsel %vm1420_vm0, %v796_v3, 0.0  ;;  %v802_v6 = vld.sshfl [vmem:[#allocation1] sm:$0xff pattern:$0x75316420]  ;;  %vm1421_vm1 = vcmp.lt.s32.totalorder %v847_v16, 15 }
   0xb   :  { %268 = vrot.lane.b32.xlu1 %v74_v4, %s749_s22  ;;  %241 = vrot.lane.b32.xlu2 %v73_v5, %s750_s23  ;;  %v71_v7 = vsel %vm1420_vm0, %v802_v6, 0.0  ;;  %v818_v8 = vld.sshfl [vmem:[#allocation1 + $0x8] sm:$0xff pattern:$0x75316420]  ;;  %vm1416_vm2 = vcmp.lt.s32.totalorder %v849_v17, 15  ;;  %vm1419_vm5 = vcmp.lt.s32.totalorder %v863_v23, 15 }
   0xc   :  { %262 = vrot.lane.b32.xlu0 %v71_v7, %s749_s22  ;;  %v72_v9 = vsel %vm1420_vm0, %v818_v8, 0.0  ;;  %vm859_vm4 = vmand %vm1416_vm2, %vm1421_vm1  ;;  %vm1415_vm6 = vcmp.lt.s32.totalorder %v865_v24, 15  ;;  %vm1434_vm9 = vcmp.gt.s32.totalorder %v863_v23, 0  ;;  %vm1417_vm10 = vcmp.gt.s32.totalorder %v847_v16, 0 }
   0xd   :  { %vm877_vm7 = vmand %vm1415_vm6, %vm1419_vm5  ;;  %v938_v49 = vand.u32 15, %v26_v42  ;;  %v940_v50 = vshra.s32 %v26_v42, 4  ;;  %vm1430_vm15 = vcmp.lt.s32.totalorder %v929_v45, 15  ;;  %v757_v19 = vmov 0  }
   0xe   :  { %vm902_vm12 = vmand %vm1415_vm6, %vm1434_vm9  ;;  %747 = vset.pattern.permute.xlu2 %v757_v19  ;;  %748 = vset.pattern.permute.xlu0 %v757_v19  ;;  %v386_v19 = vld [vmem:[%s1412_s4] sm:$0xff] }
   0xf   :  { %v1453_v34 = vsel %vm902_vm12, 4294967295, %v1452_v34  ;;  %vm910_vm13 = vmand %vm1416_vm2, %vm1417_vm10  ;;  %vm1425_vm10 = vcmp.lt.s32.totalorder %v940_v50, 15 }
  0x13   :  { %243 = vrot.lane.b32.xlu2 %v74_v4, %s750_s23  ;;  %237 = vrot.lane.b32.xlu1 %v71_v7, %s750_s23 }
  0x14   :  { %266 = vrot.lane.b32.xlu0 %v73_v5, %s749_s22 }
  0x1b   :  { %214 = vrot.lane.b32.xlu2 %v74_v4, %s751_s0  ;;  %212 = vrot.lane.b32.xlu1 %v73_v5, %s751_s0 }
  0x1c   :  { %208 = vrot.lane.b32.xlu0 %v71_v7, %s751_s0 }
  0x23   :  { %189 = vrot.lane.b32.xlu2 %v74_v4, %s752_s24  ;;  %187 = vrot.lane.b32.xlu1 %v73_v5, %s752_s24 }
  0x24   :  { %183 = vrot.lane.b32.xlu0 %v71_v7, %s752_s24 }
  0x2b   :  { %160 = vrot.lane.b32.xlu2 %v72_v9, %s753_s25  ;;  %239 = vrot.lane.b32.xlu1 %v72_v9, %s750_s23 }
  0x2c   :  { %264 = vrot.lane.b32.xlu0 %v72_v9, %s749_s22 }
  0x33   :  { %210 = vrot.lane.b32.xlu2 %v72_v9, %s751_s0  ;;  %164 = vrot.lane.b32.xlu1 %v74_v4, %s753_s25 }
  0x34   :  { %162 = vrot.lane.b32.xlu0 %v73_v5, %s753_s25 }
  0x3b   :  { %135 = vrot.lane.b32.xlu2 %v74_v4, %s754_s26  ;;  %133 = vrot.lane.b32.xlu1 %v73_v5, %s754_s26 }
  0x3c   :  { %131 = vrot.lane.b32.xlu0 %v72_v9, %s754_s26 }
  0x43   :  { %108 = vrot.lane.b32.xlu2 %v73_v5, %s755_s27  ;;  %106 = vrot.lane.b32.xlu1 %v72_v9, %s755_s27 }
  0x44   :  { %185 = vrot.lane.b32.xlu0 %v72_v9, %s752_s24 }
  0x4b   :  { %79 = vrot.lane.b32.xlu2 %v73_v5, %s756_s28  ;;  %77 = vrot.lane.b32.xlu1 %v72_v9, %s756_s28 }
  0x4c   :  { %110 = vrot.lane.b32.xlu0 %v74_v4, %s755_s27 }
  0x53   :  { %129 = vrot.lane.b32.xlu2 %v71_v7, %s754_s26  ;;  %158 = vrot.lane.b32.xlu1 %v71_v7, %s753_s25 }
  0x54   :  { %81 = vrot.lane.b32.xlu0 %v74_v4, %s756_s28 }
  0x5b   :  { %75 = vrot.lane.b32.xlu1 %v71_v7, %s756_s28  ;;  %293 = vperm.xlu2 %747, %v56_v18  }
  0x5c   :  { %104 = vrot.lane.b32.xlu0 %v71_v7, %s755_s27  ;;  %v1466_v7 = vmov 0 }
  0x65   :  { %v844_v12 = vpop.permute.xlu2 %241 }
  0x6d   :  { %v244_v15 = vpop.permute.xlu2 %243 }
  0x6e   :  { %v246_v33 = vsel %vm1424_vm8, %v844_v12, %v244_v15 }
  0x75   :  { %v215_v25 = vpop.permute.xlu2 %214 }
  0x7d   :  { %v269_v20 = vpop.permute.xlu1 %268  ;;  %v190_v32 = vpop.permute.xlu2 %189 }
  0x7e   :  { %v263_v22 = vpop.permute.xlu0 %262 }
  0x7f   :  { %v274_v26 = vsel %vm1423_vm3, %v269_v20, %v263_v22 }
  0x80   :  { %688 = vmatpush.msk.msra.mxu3 %vm859_vm4, %v274_v26 }
  0x85   :  { %v238_v27 = vpop.permute.xlu1 %237  ;;  %v924_v43 = vpop.permute.xlu2 %160 }
  0x86   :  { %v267_v29 = vpop.permute.xlu0 %266  ;;  %v249_v30 = vsel %vm1424_vm8, %v244_v15, %v238_v27 }
  0x87   :  { %v271_v31 = vsel %vm1423_vm3, %v267_v29, %v269_v20  ;;  %689 = vmatpush.msk.msra.mxu3 %vm1416_vm2, %v249_v30  ;;  %vm1422_vm2 = vcmp.lt.s32.totalorder %v938_v49, 15  ;;  %v1478_v30 = vmov 0 }
  0x88   :  { %678 = vmatpush.msk.msra.mxu2 %vm877_vm7, %v271_v31 }
  0x8a   :  { %679 = vmatpush.msk.msra.mxu2 %vm1415_vm6, %v246_v33  ;;  %vm1426_vm6 = vcmp.lt.s32.totalorder %v931_v46, 15 }
  0x8d   :  { %v213_v35 = vpop.permute.xlu1 %212  ;;  %v211_v53 = vpop.permute.xlu2 %210 }
  0x8e   :  { %v209_v37 = vpop.permute.xlu0 %208  ;;  %v217_v38 = vsel %vm1427_vm11, %v213_v35, %v215_v25  ;;  %v218_v0 = vsel %vm1427_vm11, %v211_v53, %v213_v35  ;;  %v1484_v35 = vmov 0 }
  0x8f   :  { %v220_v40 = vsel %vm1427_vm11, %v215_v25, %v209_v37  ;;  %680 = vmatpush.msk.msra.mxu2 %vm902_vm12, %v217_v38  ;;  %v219_v63 = vsel %vm1427_vm11, %v209_v37, %v211_v53  ;;  %vm1438_vm11 = vcmp.gt.s32.totalorder %v865_v24, 0 }
  0x90   :  { %690 = vmatpush.msk.msra.mxu3 %vm910_vm13, %v220_v40 }
  0x95   :  { %v927_v44 = vpop.permute.xlu1 %187 }
  0x96   :  { %v933_v47 = vpop.permute.xlu0 %183  ;;  %v192_v48 = vsel %vm1418_vm14, %v927_v44, %v190_v32 }
  0x97   :  { %v195_v51 = vsel %vm1418_vm14, %v190_v32, %v933_v47  ;;  %681 = vmatpush.msk.msra.mxu2 %vm1419_vm5, %v192_v48  ;;  %vm961_vm14 = vmand %vm1426_vm6, %vm1430_vm15  ;;  %v55_v32 = vld [vmem:[%s1411_s1] sm:$0xff] }
  0x98   :  { %691 = vmatpush.msk.msra.mxu3 %vm1421_vm1, %v195_v51  ;;  %vm969_vm5 = vmand %vm1425_vm10, %vm1422_vm2  ;;  %vm1428_vm1 = vcmp.gt.s32.totalorder %v938_v49, 0 }
  0x99   :  { %682 = vmatpush.msk.msra.mxu2 %vm1420_vm0, %v796_v3  ;;  %v136_v3 = vpop.permute.xlu2 %135 }
  0x9a   :  { %692 = vmatpush.msk.msra.mxu3 %vm1420_vm0, %v794_v2  ;;  %vm1429_vm0 = vcmp.gt.s32.totalorder %v929_v45, 0 }
  0x9b   :  { %vm987_vm2 = vmand %vm1426_vm6, %vm1429_vm0  ;;  %vm1465_vm0 = vcmp.lt.s32.totalorder %v847_v16, 15 }
  0x9d   :  { %v240_v54 = vpop.permute.xlu1 %239 }
  0x9e   :  { %v265_v56 = vpop.permute.xlu0 %264  ;;  %v248_v60 = vsel %vm1424_vm8, %v238_v27, %v240_v54  ;;  %v247_v61 = vsel %vm1424_vm8, %v240_v54, %v844_v12  ;;  %vm1431_vm8 = vcmp.lt.s32.totalorder %v842_v11, 1 }
  0x9f   :  { %v273_v57 = vsel %vm1423_vm3, %v263_v22, %v265_v56  ;;  %v272_v58 = vsel %vm1423_vm3, %v265_v56, %v267_v29  ;;  %vm1000_vm3 = vmand %vm1425_vm10, %vm1428_vm1  ;;  %vm1432_vm1 = vcmp.lt.s32.totalorder %v842_v11, 15 }
  0xa0   :  { %658 = vmatpush.msk.msra.mxu0 %vm961_vm14, %v273_v57  ;;  %668 = vmatpush.msk.msra.mxu1 %vm969_vm5, %v272_v58 }
  0xa1   :  { %v109_v15 = vpop.permute.xlu2 %108 }
  0xa2   :  { %659 = vmatpush.msk.msra.mxu0 %vm1426_vm6, %v248_v60  ;;  %669 = vmatpush.msk.msra.mxu1 %vm1425_vm10, %v247_v61  ;;  %vm1464_vm10 = vcmp.gt.s32.totalorder %v847_v16, 0  ;;  %vm1433_vm6 = vcmp.gt.s32.totalorder %v849_v17, 0 }
  0xa3   :  { %vm1033_vm15 = vmand %vm1433_vm6, %vm1465_vm0  ;;  %vm1436_vm0 = vcmp.lt.s32.totalorder %v842_v11, 16  ;;  %vm1473_vm6 = vcmp.lt.s32.totalorder %v929_v45, 15 }
  0xa4   :  { %660 = vmatpush.msk.msra.mxu0 %vm987_vm2, %v219_v63  ;;  %670 = vmatpush.msk.msra.mxu1 %vm1000_vm3, %v218_v0  ;;  %v1467_v7 = vsel %vm1033_vm15, 4294967295, %v1466_v7 }
  0xa5   :  { %v165_v1 = vpop.permute.xlu1 %164 }
  0xa6   :  { %v163_v2 = vpop.permute.xlu0 %162 }
  0xa7   :  { %v168_v4 = vsel %vm1431_vm8, %v924_v43, %v163_v2  ;;  %v167_v5 = vsel %vm1431_vm8, %v163_v2, %v165_v1  ;;  %vm1468_vm8 = vcmp.lt.s32.totalorder %v863_v23, 15 }
  0xa8   :  { %683 = vmatpush.msk.msra.mxu2 %vm1434_vm9, %v168_v4  ;;  %693 = vmatpush.msk.msra.mxu3 %vm1464_vm10, %v167_v5  ;;  %vm1041_vm10 = vmand %vm1438_vm11, %vm1468_vm8  ;;  %vm1471_vm8 = vcmp.lt.s32.totalorder %v842_v11, 127  ;;  %vm1474_vm9 = vcmp.lt.s32.totalorder %v938_v49, 15 }
  0xa9   :  { %v1470_v10 = vsel %vm1041_vm10, 4294967295, %v1469_v10  ;;  %v80_v29 = vpop.permute.xlu2 %79 }
  0xad   :  { %v134_v9 = vpop.permute.xlu1 %133 }
  0xae   :  { %v132_v12 = vpop.permute.xlu0 %131  ;;  %v138_v13 = vsel %vm1432_vm1, %v134_v9, %v136_v3 }
  0xaf   :  { %v139_v14 = vsel %vm1432_vm1, %v132_v12, %v134_v9  ;;  %694 = vmatpush.msk.msra.mxu3 %vm1033_vm15, %v138_v13  ;;  %vm1472_vm1 = vmmov %vm1471_vm8  ;;  %vm1475_vm15 = vcmask 1043456  }
  0xb0   :  { %684 = vmatpush.msk.msra.mxu2 %vm1041_vm10, %v139_v14 }
  0xb1   :  { %v130_v37 = vpop.permute.xlu2 %129 }
  0xb5   :  { %v107_v20 = vpop.permute.xlu1 %106 }
  0xb6   :  { %v186_v22 = vpop.permute.xlu0 %185  ;;  %v114_v25 = vsel %vm1436_vm0, %v107_v20, %v109_v15  ;;  %vm1476_vm0 = vmmov %vm1475_vm15 }
  0xb7   :  { %v194_v26 = vsel %vm1471_vm8, %v933_v47, %v186_v22  ;;  %v193_v27 = vsel %vm1472_vm1, %v186_v22, %v927_v44  ;;  %685 = vmatpush.msk.msra.mxu2 %vm1438_vm11, %v114_v25  ;;  %vm1440_vm8 = vcmp.lt.s32.totalorder %v842_v11, 17  ;;  %vm1477_vm1 = vcmp.gt.s32.totalorder %v863_v23, 0 }
  0xb8   :  { %661 = vmatpush.msk.msra.mxu0 %vm1473_vm6, %v194_v26  ;;  %671 = vmatpush.msk.msra.mxu1 %vm1474_vm9, %v193_v27  ;;  %vm1080_vm10 = vmand %vm1438_vm11, %vm1477_vm1  ;;  %vm1441_vm6 = vcmask 588800   ;;  %vm1480_vm9 = vcmp.lt.s32.totalorder %v842_v11, 16  ;;  %vm1444_vm1 = vcmp.gt.s32.totalorder %v940_v50, 0  ;;  %vm1482_vm11 = vcmp.gt.s32.totalorder %v847_v16, 0 }
  0xb9   :  { %v1479_v30 = vsel %vm1080_vm10, 4294967295, %v1478_v30  ;;  %v1492_v44 = vmov 0  ;;  %v294_v63 = vpop.permute.xlu2 %293 }
  0xba   :  { %662 = vmatpush.msk.msra.mxu0 %vm1475_vm15, %v802_v6  ;;  %672 = vmatpush.msk.msra.mxu1 %vm1476_vm0, %v818_v8  ;;  %vm1481_vm15 = vcmp.gt.s32.totalorder %v849_v17, 0  ;;  %vm1443_vm0 = vcmp.gt.s32.totalorder %v931_v46, 0 }
  0xbb   :  { %vm1483_vm12 = vmmov %vm1481_vm15 }
  0xbd   :  { %v78_v31 = vpop.permute.xlu1 %77 }
  0xbe   :  { %v111_v6 = vpop.permute.xlu0 %110  ;;  %v85_v8 = vsel %vm1440_vm8, %v78_v31, %v80_v29  ;;  %vm1102_vm8 = vmand %vm1483_vm12, %vm1482_vm11  ;;  %vm1491_vm12 = vcmp.lt.s32.totalorder %v938_v49, 15 }
  0xbf   :  { %v113_v33 = vsel %vm1480_vm9, %v109_v15, %v111_v6  ;;  %686 = vmatpush.msk.msra.mxu2 %vm1080_vm10, %v85_v8  ;;  %v1485_v35 = vsel %vm1102_vm8, 4294967295, %v1484_v35  ;;  %vm1486_vm9 = vcmp.lt.s32.totalorder %v929_v45, 15  ;;  %vm1123_vm10 = vmand %vm1444_vm1, %vm1491_vm12 }
  0xc0   :  { %695 = vmatpush.msk.msra.mxu3 %vm1481_vm15, %v113_v33  ;;  %687 = vmatmul.msk.f32.vlgmr.msra.gmra.mxu2 %vm1441_vm6, %v55_v32  ;;  %vm1110_vm15 = vmand %vm1443_vm0, %vm1486_vm9  ;;  %vm1489_vm6 = vcmp.lt.s32.totalorder %v842_v11, 1  ;;  %v1493_v44 = vsel %vm1123_vm10, 4294967295, %v1492_v44  ;;  %vm1494_vm9 = vcmp.gt.s32.totalorder %v929_v45, 0  ;;  %vm1495_vm0 = vcmp.gt.s32.totalorder %v938_v49, 0 }
  0xc1   :  { %v1488_v39 = vsel %vm1110_vm15, 4294967295, %v1487_v39  ;;  %vm1490_vm11 = vmmov %vm1489_vm6 }
  0xc5   :  { %v159_v38 = vpop.permute.xlu1 %158 }
  0xc6   :  { %v82_v40 = vpop.permute.xlu0 %81  ;;  %v170_v41 = vsel %vm1489_vm6, %v165_v1, %v159_v38  ;;  %v169_v42 = vsel %vm1490_vm11, %v159_v38, %v924_v43  ;;  %vm1496_vm6 = vcmp.lt.s32.totalorder %v842_v11, 17  ;;  %vm1497_vm11 = vcmp.lt.s32.totalorder %v842_v11, 15 }
  0xc7   :  { %663 = vmatpush.msk.msra.mxu0 %vm1494_vm9, %v170_v41  ;;  %673 = vmatpush.msk.msra.mxu1 %vm1495_vm0, %v169_v42  ;;  %v84_v47 = vsel %vm1496_vm6, %v80_v29, %v82_v40  ;;  %v141_v43 = vsel %vm1497_vm11, %v136_v3, %v130_v37  ;;  %vm1498_vm12 = vmmov %vm1497_vm11  ;;  %vm1499_vm9 = vcmask 588800   ;;  %vm1500_vm0 = vcmp.gt.s32.totalorder %v929_v45, 0 }
  0xc8   :  { %696 = vmatpush.msk.msra.mxu3 %vm1102_vm8, %v84_v47  ;;  %v140_v48 = vsel %vm1498_vm12, %v130_v37, %v132_v12  ;;  %vm1501_vm6 = vcmp.gt.s32.totalorder %v931_v46, 0  ;;  %vm1504_vm11 = vcmp.lt.s32.totalorder %v842_v11, 16 }
  0xc9   :  { %664 = vmatpush.msk.msra.mxu0 %vm1110_vm15, %v141_v43  ;;  %674 = vmatpush.msk.msra.mxu1 %vm1123_vm10, %v140_v48  ;;  %vm1148_vm1 = vmand %vm1501_vm6, %vm1500_vm0  ;;  %vm1506_vm10 = vcmp.gt.s32.totalorder %v938_v49, 0 }
  0xca   :  { %697 = vmatmul.msk.f32.vlgmr.msra.gmra.mxu3 %vm1499_vm9, %v55_v32  ;;  %vm1505_vm12 = vmmov %vm1504_vm11  ;;  %vm1507_vm9 = vcmp.gt.s32.totalorder %v940_v50, 0 }
  0xcb   :  { %vm1160_vm15 = vmand %vm1507_vm9, %vm1506_vm10  ;;  %vm1514_vm10 = vcmask 588800  }
  0xcc   :  { %vm1510_vm8 = vmmov %vm1501_vm6  ;;  %vm1512_vm6 = vcmp.lt.s32.totalorder %v842_v11, 17 }
  0xcd   :  { %v76_v51 = vpop.permute.xlu1 %75  ;;  %vm1511_vm0 = vmmov %vm1507_vm9  ;;  %vm1517_vm9 = vcmp.lt.s32.totalorder %v842_v11, 112 }
  0xce   :  { %v105_v53 = vpop.permute.xlu0 %104  ;;  %v87_v60 = vsel %vm1512_vm6, %v82_v40, %v76_v51 }
  0xcf   :  { %v116_v56 = vsel %vm1504_vm11, %v111_v6, %v105_v53  ;;  %v115_v57 = vsel %vm1505_vm12, %v105_v53, %v107_v20  ;;  %vm1513_vm11 = vmmov %vm1512_vm6  ;;  %vm1519_vm6 = vcmp.lt.s32.totalorder %v842_v11, 113 }
  0xd0   :  { %665 = vmatpush.msk.msra.mxu0 %vm1510_vm8, %v116_v56  ;;  %675 = vmatpush.msk.msra.mxu1 %vm1511_vm0, %v115_v57  ;;  %v86_v61 = vsel %vm1513_vm11, %v76_v51, %v78_v31  ;;  %vm1515_vm12 = vmmov %vm1514_vm10  ;;  %vm1516_vm8 = vcmp.lt.s32.totalorder %v842_v11, 111  ;;  %vm1518_vm0 = vcmp.lt.s32.totalorder %v849_v17, 15 }
  0xd1   :  { %vm1521_vm11 = vmmov %vm1516_vm8 }
  0xd2   :  { %666 = vmatpush.msk.msra.mxu0 %vm1148_vm1, %v87_v60  ;;  %676 = vmatpush.msk.msra.mxu1 %vm1160_vm15, %v86_v61 }
  0xd3   :  { %667 = vmatmul.msk.f32.vlgmr.msra.gmra.mxu0 %vm1514_vm10, %v55_v32  ;;  %677 = vmatmul.msk.f32.vlgmr.msra.gmra.mxu1 %vm1515_vm12, %v55_v32  ;;  %vm1522_vm10 = vcmp.lt.s32.totalorder %v847_v16, 15  ;;  %vm1524_vm12 = vmmov %vm1516_vm8 }
 0x143   :  { %v357_v14 = vpop.f32.mrf.mxu2 }
 0x144   :  { %v358_v15 = vadd.f32 %v357_v14, %v294_v63 }
 0x146   :  { %v1199_v18 = vmax.f32 %v358_v15, 0.0 }
 0x14d   :  { %v377_v9 = vpop.f32.mrf.mxu3 }
 0x14e   :  { %v378_v12 = vadd.f32 %v377_v9, %v294_v63 }
 0x150   :  { %v317_v0 = vpop.f32.mrf.mxu0  ;;  %v337_v1 = vpop.f32.mrf.mxu1  ;;  %v383_v13 = vmax.f32 %v378_v12, 0.0 }
 0x151   :  { %v318_v2 = vadd.f32 %v317_v0, %v294_v63  ;;  %v338_v3 = vadd.f32 %v337_v1, %v294_v63 }
 0x153   :  { %v1178_v4 = vmax.f32 %v318_v2, 0.0  ;;  %v1180_v5 = vmax.f32 %v338_v3, 0.0 }
 0x155   :  { %500 = vrot.lane.b32.xlu0 %v1178_v4, %s749_s22  ;;  %438 = vrot.lane.b32.xlu2 %v1180_v5, %s753_s25 }
 0x156   :  { %486 = vrot.lane.b32.xlu1 %v1180_v5, %s750_s23 }
 0x15d   :  { %484 = vrot.lane.b32.xlu0 %v1178_v4, %s750_s23  ;;  %470 = vrot.lane.b32.xlu2 %v1180_v5, %s751_s0 }
 0x15e   :  { %406 = vrot.lane.b32.xlu1 %v1180_v5, %s755_s27 }
 0x165   :  { %468 = vrot.lane.b32.xlu0 %v1178_v4, %s751_s0  ;;  %506 = vrot.lane.b32.xlu2 %v383_v13, %s749_s22 }
 0x166   :  { %390 = vrot.lane.b32.xlu1 %v1180_v5, %s756_s28 }
 0x16d   :  { %452 = vrot.lane.b32.xlu0 %v1178_v4, %s752_s24  ;;  %490 = vrot.lane.b32.xlu2 %v383_v13, %s750_s23 }
 0x16e   :  { %504 = vrot.lane.b32.xlu1 %v1199_v18, %s749_s22 }
 0x175   :  { %474 = vrot.lane.b32.xlu2 %v383_v13, %s751_s0  ;;  %502 = vrot.lane.b32.xlu0 %v1180_v5, %s749_s22 }
 0x176   :  { %488 = vrot.lane.b32.xlu1 %v1199_v18, %s750_s23 }
 0x17d   :  { %458 = vrot.lane.b32.xlu2 %v383_v13, %s752_s24  ;;  %422 = vrot.lane.b32.xlu0 %v1180_v5, %s754_s26 }
 0x17e   :  { %472 = vrot.lane.b32.xlu1 %v1199_v18, %s751_s0 }
 0x185   :  { %426 = vrot.lane.b32.xlu2 %v383_v13, %s754_s26  ;;  %454 = vrot.lane.b32.xlu0 %v1180_v5, %s752_s24 }
 0x186   :  { %456 = vrot.lane.b32.xlu1 %v1199_v18, %s752_s24 }
 0x18d   :  { %408 = vrot.lane.b32.xlu2 %v1199_v18, %s755_s27  ;;  %440 = vrot.lane.b32.xlu0 %v1199_v18, %s753_s25 }
 0x18e   :  { %442 = vrot.lane.b32.xlu1 %v383_v13, %s753_s25 }
 0x195   :  { %392 = vrot.lane.b32.xlu2 %v1199_v18, %s756_s28  ;;  %410 = vrot.lane.b32.xlu0 %v383_v13, %s755_s27 }
 0x196   :  { %424 = vrot.lane.b32.xlu1 %v1199_v18, %s754_s26 }
 0x19d   :  { %420 = vrot.lane.b32.xlu2 %v1178_v4, %s754_s26  ;;  %394 = vrot.lane.b32.xlu0 %v383_v13, %s756_s28 }
 0x19e   :  { %436 = vrot.lane.b32.xlu1 %v1178_v4, %s753_s25 }
 0x1a5   :  { %518 = vperm.xlu2 %747, %v386_v19   ;;  %404 = vrot.lane.b32.xlu0 %v1178_v4, %s755_s27 }
 0x1a6   :  { %388 = vrot.lane.b32.xlu1 %v1178_v4, %s756_s28 }
 0x1af   :  { %v1243_v20 = vpop.permute.xlu2 %438 }
 0x1b7   :  { %v471_v22 = vpop.permute.xlu2 %470 }
 0x1bf   :  { %v507_v25 = vpop.permute.xlu2 %506 }
 0x1c7   :  { %v501_v26 = vpop.permute.xlu0 %500  ;;  %v491_v31 = vpop.permute.xlu2 %490 }
 0x1c8   :  { %v487_v27 = vpop.permute.xlu1 %486  ;;  %v511_v29 = vsel %vm1516_vm8, %v507_v25, %v501_v26 }
 0x1c9   :  { %728 = vmatpush.msk.msrb.mxu3 %vm859_vm4, %v511_v29  ;;  %vm1520_vm4 = vcmp.lt.s32.totalorder %v842_v11, 127 }
 0x1cf   :  { %v485_v32 = vpop.permute.xlu0 %484  ;;  %v475_v33 = vpop.permute.xlu2 %474 }
 0x1d0   :  { %v1249_v6 = vpop.permute.xlu1 %406  ;;  %v495_v8 = vsel %vm1517_vm9, %v491_v31, %v485_v32 }
 0x1d1   :  { %729 = vmatpush.msk.msrb.mxu3 %vm1518_vm0, %v495_v8 }
 0x1d7   :  { %v469_v37 = vpop.permute.xlu0 %468  ;;  %v459_v21 = vpop.permute.xlu2 %458 }
 0x1d8   :  { %v1255_v38 = vpop.permute.xlu1 %390  ;;  %v479_v40 = vsel %vm1519_vm6, %v475_v33, %v469_v37  ;;  %vm1529_vm6 = vcmp.lt.s32.totalorder %v931_v46, 15 }
 0x1d9   :  { %730 = vmatpush.msk.msrb.mxu3 %vm910_vm13, %v479_v40  ;;  %vm1523_vm13 = vmmov %vm1516_vm8 }
 0x1da   :  { %vm1525_vm8 = vmmov %vm1517_vm9 }
 0x1db   :  { %vm1527_vm9 = vmmov %vm1525_vm8 }
 0x1dc   :  { %v494_v28 = vsel %vm1527_vm9, %v485_v32, %v487_v27  ;;  %vm1528_vm0 = vmmov %vm1525_vm8  ;;  %vm1541_vm9 = vcmp.lt.s32.totalorder %v842_v11, 1 }
 0x1df   :  { %v453_v41 = vpop.permute.xlu0 %452  ;;  %v427_v0 = vpop.permute.xlu2 %426 }
 0x1e0   :  { %v505_v42 = vpop.permute.xlu1 %504  ;;  %v463_v47 = vsel %vm1520_vm4, %v459_v21, %v453_v41 }
 0x1e1   :  { %v508_v43 = vsel %vm1521_vm11, %v505_v42, %v507_v25  ;;  %731 = vmatpush.msk.msrb.mxu3 %vm1522_vm10, %v463_v47  ;;  %vm1534_vm10 = vnez %v1453_v34 }
 0x1e2   :  { %718 = vmatpush.msk.msrb.mxu2 %vm877_vm7, %v508_v43  ;;  %vm1526_vm7 = vcmp.lt.s32.totalorder %v865_v24, 15 }
 0x1e3   :  { %612 = vmatpush.msrb.mxu3 %v383_v13 }
 0x1e7   :  { %v503_v48 = vpop.permute.xlu0 %502  ;;  %v409_v34 = vpop.permute.xlu2 %408 }
 0x1e8   :  { %v489_v51 = vpop.permute.xlu1 %488  ;;  %v510_v36 = vsel %vm1523_vm13, %v501_v26, %v503_v48  ;;  %v509_v53 = vsel %vm1524_vm12, %v503_v48, %v505_v42  ;;  %vm1535_vm13 = vcmp.lt.s32.totalorder %v842_v11, 127 }
 0x1e9   :  { %698 = vmatpush.msk.msrb.mxu0 %vm961_vm14, %v510_v36  ;;  %708 = vmatpush.msk.msrb.mxu1 %vm969_vm5, %v509_v53  ;;  %v492_v56 = vsel %vm1525_vm8, %v489_v51, %v491_v31  ;;  %v493_v57 = vsel %vm1528_vm0, %v487_v27, %v489_v51  ;;  %vm1530_vm14 = vcmp.lt.s32.totalorder %v940_v50, 15  ;;  %vm1531_vm5 = vcmp.lt.s32.totalorder %v842_v11, 113  ;;  %vm1537_vm12 = vmmov %vm1535_vm13 }
 0x1ea   :  { %719 = vmatpush.msk.msrb.mxu2 %vm1526_vm7, %v492_v56  ;;  %v478_v52 = vsel %vm1531_vm5, %v469_v37, %v471_v22  ;;  %vm1532_vm4 = vmmov %vm1531_vm5  ;;  %vm1539_vm7 = vcmp.lt.s32.totalorder %v938_v49, 15  ;;  %vm1542_vm0 = vcmp.gt.s32.totalorder %v863_v23, 0  ;;  %vm1545_vm5 = vcmp.lt.s32.totalorder %v842_v11, 15 }
 0x1eb   :  { %699 = vmatpush.msk.msrb.mxu0 %vm1529_vm6, %v494_v28  ;;  %709 = vmatpush.msk.msrb.mxu1 %vm1530_vm14, %v493_v57  ;;  %vm1533_vm11 = vmmov %vm1532_vm4  ;;  %vm1544_vm14 = vcmp.gt.s32.totalorder %v847_v16, 0 }
 0x1ec   :  { %vm1538_vm8 = vmmov %vm1537_vm12 }
 0x1ed   :  { %700 = vmatpush.msk.msrb.mxu0 %vm987_vm2, %v478_v52  ;;  %vm1536_vm2 = vcmp.lt.s32.totalorder %v929_v45, 15  ;;  %vm1543_vm6 = vmmov %vm1541_vm9 }
 0x1ef   :  { %v423_v55 = vpop.permute.xlu0 %422 }
 0x1f0   :  { %v473_v60 = vpop.permute.xlu1 %472 }
 0x1f1   :  { %v477_v61 = vsel %vm1532_vm4, %v471_v22, %v473_v60  ;;  %v476_v63 = vsel %vm1533_vm11, %v473_v60, %v475_v33  ;;  %vm1546_vm4 = vmmov %vm1545_vm5  ;;  %vm1547_vm11 = vnez %v1470_v10  ;;  %v384_v10 = vld [vmem:[%s1413_s3] sm:$0xff] }
 0x1f2   :  { %710 = vmatpush.msk.msrb.mxu1 %vm1000_vm3, %v477_v61  ;;  %720 = vmatpush.msk.msrb.mxu2 %vm1534_vm10, %v476_v63  ;;  %vm1540_vm3 = vcmp.lt.s32.totalorder %v863_v23, 15  ;;  %vm1548_vm10 = vnez %v1467_v7 }
 0x1f7   :  { %v455_v1 = vpop.permute.xlu0 %454 }
 0x1f8   :  { %v457_v2 = vpop.permute.xlu1 %456  ;;  %v462_v59 = vsel %vm1535_vm13, %v453_v41, %v455_v1  ;;  %vm1549_vm13 = vcmp.lt.s32.totalorder %v842_v11, 16 }
 0x1f9   :  { %701 = vmatpush.msk.msrb.mxu0 %vm1536_vm2, %v462_v59  ;;  %v461_v3 = vsel %vm1537_vm12, %v455_v1, %v457_v2  ;;  %v460_v9 = vsel %vm1538_vm8, %v457_v2, %v459_v21  ;;  %v413_v16 = vsel %vm1549_vm13, %v1249_v6, %v409_v34  ;;  %vm1550_vm2 = vmmov %vm1549_vm13  ;;  %vm1551_vm12 = vcmp.gt.s32.totalorder %v865_v24, 0 }
 0x1fa   :  { %711 = vmatpush.msk.msrb.mxu1 %vm1539_vm7, %v461_v3  ;;  %721 = vmatpush.msk.msrb.mxu2 %vm1540_vm3, %v460_v9  ;;  %vm1552_vm8 = vcmp.gt.s32.totalorder %v849_v17, 0  ;;  %vm1553_vm7 = vcmp.lt.s32.totalorder %v842_v11, 17  ;;  %vm1554_vm3 = vnez %v1479_v30  ;;  %vm1562_vm13 = vcmp.lt.s32.totalorder %v842_v11, 15 }
 0x1fb   :  { %543 = vmatpush.msrb.mxu0 %v1178_v4  ;;  %v387_v4 = vld [vmem:[%s1412_s4 + $0x8] sm:$0xff] }
 0x1fc   :  { %566 = vmatpush.msrb.mxu1 %v1180_v5  ;;  %589 = vmatpush.msrb.mxu2 %v1199_v18  ;;  %v393_v5 = vpop.permute.xlu2 %392 }
 0x1fd   :  { %523 = vperm.xlu0 %748, %v387_v4   ;;  %v397_v7 = vsel %vm1553_vm7, %v1255_v38, %v393_v5 }
 0x1ff   :  { %v441_v62 = vpop.permute.xlu0 %440 }
 0x200   :  { %v443_v12 = vpop.permute.xlu1 %442  ;;  %v445_v13 = vsel %vm1541_vm9, %v1243_v20, %v441_v62  ;;  %vm1555_vm9 = vcmask 588800  }
 0x201   :  { %722 = vmatpush.msk.msrb.mxu2 %vm1542_vm0, %v445_v13  ;;  %v444_v14 = vsel %vm1543_vm6, %v441_v62, %v443_v12  ;;  %vm1556_vm0 = vmmov %vm1553_vm7 }
 0x202   :  { %732 = vmatpush.msk.msrb.mxu3 %vm1544_vm14, %v444_v14  ;;  %vm1557_vm14 = vmmov %vm1543_vm6 }
 0x203   :  { %vm1566_vm7 = vmmov %vm1555_vm9 }
 0x204   :  { %v421_v26 = vpop.permute.xlu2 %420 }
 0x205   :  { %v431_v30 = vsel %vm1562_vm13, %v427_v0, %v421_v26 }
 0x207   :  { %v411_v15 = vpop.permute.xlu0 %410 }
 0x208   :  { %v425_v18 = vpop.permute.xlu1 %424  ;;  %v412_v22 = vsel %vm1550_vm2, %v409_v34, %v411_v15  ;;  %vm1563_vm2 = vmmov %vm1562_vm13 }
 0x209   :  { %v429_v19 = vsel %vm1545_vm5, %v423_v55, %v425_v18  ;;  %v428_v23 = vsel %vm1546_vm4, %v425_v18, %v427_v0  ;;  %vm1558_vm5 = vnez %v1485_v35  ;;  %vm1559_vm4 = vcmp.gt.s32.totalorder %v929_v45, 0  ;;  %v385_v45 = vld [vmem:[%s1413_s3 + $0x8] sm:$0xff] }
 0x20a   :  { %723 = vmatpush.msk.msrb.mxu2 %vm1547_vm11, %v429_v19  ;;  %733 = vmatpush.msk.msrb.mxu3 %vm1548_vm10, %v428_v23  ;;  %vm1560_vm11 = vcmp.gt.s32.totalorder %v938_v49, 0  ;;  %vm1561_vm10 = vmmov %vm1555_vm9  ;;  %v430_v31 = vsel %vm1563_vm2, %v421_v26, %v423_v55 }
 0x20c   :  { %724 = vmatpush.msk.msrb.mxu2 %vm1551_vm12, %v413_v16  ;;  %734 = vmatpush.msk.msrb.mxu3 %vm1552_vm8, %v412_v22  ;;  %vm1564_vm12 = vnez %v1488_v39  ;;  %vm1565_vm8 = vnez %v1493_v44 }
 0x20e   :  { %725 = vmatpush.msk.msrb.mxu2 %vm1554_vm3, %v397_v7  ;;  %vm1567_vm3 = vcmp.lt.s32.totalorder %v842_v11, 16 }
 0x20f   :  { %726 = vmatmul.msk.f32.vlgmr.msrb.gmra.mxu2 %vm1555_vm9, %v384_v10  ;;  %v395_v25 = vpop.permute.xlu0 %394  ;;  %vm1568_vm9 = vmmov %vm1567_vm3 }
 0x210   :  { %v437_v24 = vpop.permute.xlu1 %436  ;;  %v396_v17 = vsel %vm1556_vm0, %v393_v5, %v395_v25  ;;  %vm1569_vm0 = vcmp.gt.s32.totalorder %v931_v46, 0 }
 0x211   :  { %v447_v27 = vsel %vm1543_vm6, %v443_v12, %v437_v24  ;;  %v446_v29 = vsel %vm1557_vm14, %v437_v24, %v1243_v20  ;;  %735 = vmatpush.msk.msrb.mxu3 %vm1558_vm5, %v396_v17  ;;  %vm1570_vm6 = vcmp.gt.s32.totalorder %v940_v50, 0  ;;  %vm1571_vm14 = vcmp.lt.s32.totalorder %v842_v11, 17  ;;  %v519_v50 = vpop.permute.xlu2 %518 }
 0x212   :  { %702 = vmatpush.msk.msrb.mxu0 %vm1559_vm4, %v447_v27  ;;  %712 = vmatpush.msk.msrb.mxu1 %vm1560_vm11, %v446_v29  ;;  %vm1572_vm5 = vmmov %vm1571_vm14 }
 0x213   :  { %736 = vmatmul.msk.f32.vlgmr.msrb.gmra.mxu3 %vm1561_vm10, %v384_v10  ;;  %vm1573_vm4 = vmmov %vm1566_vm7 }
 0x214   :  { %703 = vmatpush.msk.msrb.mxu0 %vm1564_vm12, %v431_v30  ;;  %713 = vmatpush.msk.msrb.mxu1 %vm1565_vm8, %v430_v31  ;;  %vm1574_vm11 = vmmov %vm1573_vm4 }
 0x215   :  { %vm1575_vm10 = vmmov %vm1573_vm4 }
 0x216   :  { %vm1576_vm13 = vmmov %vm1573_vm4 }
 0x217   :  { %v405_v49 = vpop.permute.xlu0 %404  ;;  %727 = vmatmul.msk.f32.gmra.mxu2 %vm1566_vm7, %v385_v45  ;;  %vm1577_vm2 = vmmov %vm1573_vm4 }
 0x218   :  { %v389_v35 = vpop.permute.xlu1 %388  ;;  %v415_v20 = vsel %vm1567_vm3, %v411_v15, %v405_v49  ;;  %v414_v32 = vsel %vm1568_vm9, %v405_v49, %v1249_v6 }
 0x219   :  { %704 = vmatpush.msk.msrb.mxu0 %vm1569_vm0, %v415_v20  ;;  %714 = vmatpush.msk.msrb.mxu1 %vm1570_vm6, %v414_v32  ;;  %v399_v39 = vsel %vm1571_vm14, %v395_v25, %v389_v35  ;;  %v398_v44 = vsel %vm1572_vm5, %v389_v35, %v1255_v38 }
 0x21b   :  { %705 = vmatpush.msk.msrb.mxu0 %vm1148_vm1, %v399_v39  ;;  %715 = vmatpush.msk.msrb.mxu1 %vm1160_vm15, %v398_v44  ;;  %vm648_vm1 = vcmask 7168   ;;  %vm651_vm15 = vcmask 15360  }
 0x21c   :  { %706 = vmatmul.msk.f32.vlgmr.msrb.gmra.mxu0 %vm1573_vm4, %v384_v10  ;;  %716 = vmatmul.msk.f32.vlgmr.msrb.gmra.mxu1 %vm1574_vm11, %v384_v10 }
 0x21d   :  { %737 = vmatmul.msk.f32.gmra.mxu3 %vm1575_vm10, %v385_v45 }
 0x224   :  { %707 = vmatmul.msk.f32.gmra.mxu0 %vm1576_vm13, %v385_v45  ;;  %717 = vmatmul.msk.f32.gmra.mxu1 %vm1577_vm2, %v385_v45 }
 0x26f   :  { %v524_v43 = vpop.permute.xlu0 %523 }
 0x292   :  { %v595_v46 = vpop.f32.mrf.mxu2 }
 0x293   :  { %v596_v11 = vadd.f32 %v595_v46, %v519_v50 }
 0x295   :  { %v626_v54 = vmax.f32 %v596_v11, 0.0 }
 0x296   :  { %v618_v6 = vpop.f32.mrf.mxu3 }
 0x297   :  { %v619_v8 = vadd.f32 %v618_v6, %v519_v50 }
 0x299   :  { %v627_v33 = vmax.f32 %v619_v8, 0.0  ;;  %v549_v37 = vpop.f32.mrf.mxu0  ;;  %v572_v58 = vpop.f32.mrf.mxu1 }
 0x29a   :  { %v550_v38 = vadd.f32 %v549_v37, %v519_v50  ;;  %v573_v40 = vadd.f32 %v572_v58, %v519_v50  ;;  %v598_v56 = vpop.f32.mrf.mxu2 }
 0x29b   :  { %v640_v21 = vadd.f32 %v627_v33, %v626_v54  ;;  %v599_v60 = vadd.f32 %v598_v56, %v524_v43 }
 0x29c   :  { %v624_v41 = vmax.f32 %v550_v38, 0.0  ;;  %v625_v42 = vmax.f32 %v573_v40, 0.0 }
 0x29d   :  { %641 = vadd.xlane.f32.xlu0 %v640_v21  ;;  %v630_v63 = vmax.f32 %v599_v60, 0.0 }
 0x29e   :  { %v632_v47 = vadd.f32 %v625_v42, %v624_v41 }
 0x2a0   :  { %633 = vadd.xlane.f32.xlu1 %v632_v47  ;;  %v621_v28 = vpop.f32.mrf.mxu3 }
 0x2a1   :  { %v552_v48 = vpop.f32.mrf.mxu0  ;;  %v575_v51 = vpop.f32.mrf.mxu1  ;;  %v622_v61 = vadd.f32 %v621_v28, %v524_v43 }
 0x2a2   :  { %v553_v36 = vadd.f32 %v552_v48, %v524_v43  ;;  %v576_v53 = vadd.f32 %v575_v51, %v524_v43 }
 0x2a3   :  { %v631_v0 = vmax.f32 %v622_v61, 0.0 }
 0x2a4   :  { %v628_v57 = vmax.f32 %v553_v36, 0.0  ;;  %v629_v52 = vmax.f32 %v576_v53, 0.0 }
 0x2a5   :  { %v643_v1 = vadd.f32 %v631_v0, %v630_v63 }
 0x2a6   :  { %v635_v55 = vadd.f32 %v629_v52, %v628_v57 }
 0x2a8   :  { %636 = vadd.xlane.f32.xlu2 %v635_v55 }
 0x2b0   :  { %644 = vadd.xlane.f32.xlu2 %v643_v1 }
 0x310   :  { %v642_v2 = vpop.xlane.xlu0 %641 }
 0x311   :  { %v646_v3 = vmul.f32 0.00390625, %v642_v2 }
 0x313   :  { %v634_v59 = vpop.xlane.xlu1 %633 }
 0x314   :  { %v638_v9 = vmul.f32 0.00390625, %v634_v59 }
 0x316   :  { %v649_v34 = vsel %vm648_vm1, %v638_v9, %v646_v3 }
 0x317   :  { %652 = vst.msk [vmem:[%s1414_s5] sm:$0xff] %vm651_vm15, %v649_v34 }
 0x31b   :  { %v637_v62 = vpop.xlane.xlu2 %636 }
 0x31c   :  { %v639_v13 = vmul.f32 0.00390625, %v637_v62 }
 0x323   :  { %v645_v12 = vpop.xlane.xlu2 %644 }
 0x324   :  { %v647_v14 = vmul.f32 0.00390625, %v645_v12 }
 0x326   :  { %v650_v4 = vsel %vm648_vm1, %v639_v13, %v647_v14 }
 0x327   :  { %653 = vst.msk [vmem:[%s1414_s5 + $0x8] sm:$0xff] %vm651_vm15, %v650_v4 }

</bundles_post_ra>
